<compile_context>
chip_gen: v7x
topology: tpu7x:2x2x1
jax: 0.10.0
libtpu: 0.0.40
codegen_flags: <defaults>
</compile_context>

<pallas_src>
import jax
import jax.numpy as jnp
from jax.experimental import pallas as pl
from jax.experimental.pallas import tpu as pltpu

_LANES = 128


def _round_up(x, m):
    return ((x + m - 1) // m) * m


def _sublane_pack(dtype):
    """Rows per packed sublane group: 8 (f32), 16 (bf16/f16), 32 (int8/fp8)."""
    itemsize = jnp.dtype(dtype).itemsize
    return max(1, 4 // itemsize) * 8


def _target_block_bytes():
    """Per-generation VMEM block budget (4 live buffers: 2x in + 2x out)."""
    try:
        kind = jax.devices()[0].device_kind.lower()
    except Exception:
        kind = ""
    if "v6" in kind or "v7" in kind:
        return 4 * 1024 * 1024   # 16 MiB live, inside 32 MiB scoped default
    return 2 * 1024 * 1024       # v5e / unknown: 8 MiB live, inside 16 MiB


def _copy_kernel(x_ref, o_ref):
    # Whole-tile move: no row loops, no slicing (single aligned full-tile
    # store keeps the vst slot fed on every generation).
    o_ref[...] = x_ref[...]


def _lane_dense_copy(arr):
    """Identity-copy a (rows, 128) array through VMEM, tiled + pipelined."""
    rows, cols = arr.shape
    assert cols == _LANES
    itemsize = jnp.dtype(arr.dtype).itemsize
    pack = _sublane_pack(arr.dtype)

    if rows <= pack:
        # Single full-array block (full-extent dims are always legal).
        tile_rows = rows
    else:
        row_bytes = cols * itemsize
        budget_rows = max(pack, (_target_block_bytes() // row_bytes) // pack * pack)
        # Cap at ~half the rows (sublane-pack aligned) so the grid has >= 2
        # tiles and v7x's second TensorCore gets work under "parallel".
        half_rows = _round_up(pl.cdiv(rows, 2), pack)
        tile_rows = max(pack, min(budget_rows, half_rows))

    grid = (pl.cdiv(rows, tile_rows),)
    total_bytes = rows * cols * itemsize
    return pl.pallas_call(
        _copy_kernel,
        out_shape=jax.ShapeDtypeStruct((rows, cols), arr.dtype),
        grid=grid,
        in_specs=[pl.BlockSpec((tile_rows, cols), lambda i: (i, 0))],
        out_specs=pl.BlockSpec((tile_rows, cols), lambda i: (i, 0)),
        compiler_params=pltpu.CompilerParams(
            dimension_semantics=("parallel",)),
        cost_estimate=pl.CostEstimate(
            flops=0, transcendentals=0, bytes_accessed=2 * total_bytes),
    )(arr)


def mnist_network_forward(x, materialize=False):
    """Equivalent of MNISTNetwork.forward: x.view(-1, 784).

    Args:
      x: array whose trailing dims flatten to 784 (e.g. (N, 1, 28, 28), NCHW).
      materialize: if True, route the flattened data through a tiled,
        lane-dense Pallas identity-copy kernel (explicit VMEM
        materialization).  Default False: the flatten is metadata-only, which
        is the optimal implementation.
    Returns:
      array of shape (N, 784), same dtype as x.
    """
    n = x.shape[0]
    flat = x.reshape(n, 784)  # metadata-only, matches torch .view(-1, 784)
    if not materialize:
        return flat

    # Always take the lane-dense path: pad the 1-D view up to a multiple of
    # 128 lanes if needed, copy as (rows, 128), then slice the pad back off.
    total = n * 784
    padded_total = _round_up(total, _LANES)
    flat_1d = flat.reshape(total)
    if padded_total != total:
        flat_1d = jnp.pad(flat_1d, (0, padded_total - total))
    dense = flat_1d.reshape(padded_total // _LANES, _LANES)  # metadata-only
    out = _lane_dense_copy(dense)
    out_1d = out.reshape(padded_total)
    if padded_total != total:
        out_1d = out_1d[:total]
    return out_1d.reshape(n, 784)


if __name__ == "__main__":
    key = jax.random.PRNGKey(0)

    # MNIST-like batch whose flattened size is a multiple of 128
    # (8 * 784 = 6272 = 49 * 128) -> no padding needed.
    x = jax.random.normal(key, (8, 1, 28, 28), dtype=jnp.float32)
    ref = x.reshape(-1, 784)

    # Default (optimal) path: metadata-only flatten, no Pallas kernel.
    y_fast = jax.block_until_ready(mnist_network_forward(x))
    assert y_fast.shape == (8, 784), y_fast.shape
    assert jnp.array_equal(y_fast, ref), "mismatch vs reference (fast path)"

    # Materialized path: exercises the tiled, lane-dense Pallas copy kernel.
    y_kern = jax.block_until_ready(mnist_network_forward(x, materialize=True))
    assert y_kern.shape == (8, 784), y_kern.shape
    assert jnp.array_equal(y_kern, ref), "mismatch vs reference (kernel path)"

    # Batch whose flattened size is NOT a multiple of 128 -> pad/slice path.
    x2 = jax.random.normal(jax.random.PRNGKey(1), (3, 1, 28, 28), jnp.float32)
    y2 = jax.block_until_ready(mnist_network_forward(x2, materialize=True))
    assert jnp.array_equal(y2, x2.reshape(-1, 784)), "mismatch (padded path)"

    # bf16 input -> exercises dtype-aware (16-row) sublane packing.
    x3 = jax.random.normal(jax.random.PRNGKey(2), (16, 1, 28, 28),
                           dtype=jnp.bfloat16)
    y3 = jax.block_until_ready(mnist_network_forward(x3, materialize=True))
    assert jnp.array_equal(y3, x3.reshape(-1, 784)), "mismatch (bf16 path)"

    print("KERNEL_OK")
</pallas_src>

<mosaic_0001>
module attributes {stable_mosaic.version = 11 : i64} {
  func.func @_copy_kernel(%arg0: i32, %arg1: memref<32x128xf32, #tpu.memory_space<vmem>>, %arg2: memref<32x128xf32, #tpu.memory_space<vmem>>) attributes {dimension_semantics = [#tpu.dimension_semantics<parallel>], iteration_bounds = array<i64: 2>, scalar_prefetch = 0 : i64, scratch_operands = 0 : i64, tpu.core_type = #tpu.core_type<tc>, window_params = [{transform_indices = @transform_0, window_bounds = array<i64: 32, 128>}, {transform_indices = @transform_1, window_bounds = array<i64: 32, 128>}]} {
    %c0 = arith.constant 0 : index
    %c0_0 = arith.constant 0 : index
    %0 = vector.load %arg1[%c0, %c0_0] : memref<32x128xf32, #tpu.memory_space<vmem>>, vector<32x128xf32>
    %c0_1 = arith.constant 0 : index
    %c0_2 = arith.constant 0 : index
    %1 = vector.load %arg2[%c0_1, %c0_2] : memref<32x128xf32, #tpu.memory_space<vmem>>, vector<32x128xf32>
    tpu.vector_store %arg2[%c0_1, %c0_2], %0 {strides = array<i32>} : memref<32x128xf32, #tpu.memory_space<vmem>>, vector<32x128xf32>,
    return
  }
  func.func @transform_0(%arg0: i32) -> (i32, i32) {
    %c0_i32 = arith.constant 0 : i32
    %c0_i32_0 = arith.constant 0 : i32
    return %arg0, %c0_i32 : i32, i32
  }
  func.func @transform_1(%arg0: i32) -> (i32, i32) {
    %c0_i32 = arith.constant 0 : i32
    %c0_i32_0 = arith.constant 0 : i32
    return %arg0, %c0_i32 : i32, i32
  }
}

</mosaic_0001>

<bundles_post_ra>
// kernel: tpu_custom_call.1
= control target key start
LH: loop header
LB: loop body
LE: loop exit
PB: predicated region body
PF: predicated region fallthrough
CT: control target
= control target key end

     0   :  { %6 = vsyncpa [#allocation3], 0  ;;  %s601_s0 = inlined_call_operand.hbm [shape: f32[49,128], index: 0, kind: input, shape index: {}]   ;;  %s602_s1 = inlined_call_operand.hbm [shape: f32[49,128], index: 1, kind: output, shape index: {}]  }
   0x1   :  { %8 = vsyncpa [#allocation3 + $0x1], 0 }
   0x2   :  { %9 = vsyncpa [#allocation4], 0 }
   0x3   :  { %11 = vsyncpa [#allocation4 + $0x1], 0  ;;  %s431_s6 = smov 0   ;;  %s433_s7 = smov 0  }
   0x4   :  { %s435_s8 = smov 0   ;;  %s437_s9 = smov 0  }
   0x5 LB: > { %s452_s10 = sadd.s32 4294967295, %s413_s9   ;;  %s252_s11 = sadd.s32 4294967294, %s413_s9   ;;  %s413_s9 = sphi %s437_s9, %s612_s9   ;;  %s409_s8 = sphi %s435_s8, %s611_s8   ;;  %s405_s7 = sphi %s433_s7, %s610_s7   ;;  %s401_s6 = sphi %s431_s6, %s609_s6  }
   0x6   : > { %s456_s12 = sadd.s32 1, %s413_s9   ;;  %s24_s13 = sadd.s32 1, %s409_s8 }
   0x7   : > { %s21_s14 = ssub.s32 %s413_s9, %s456_s12  ;;  %p31_p0 = scmp.ne.s32.totalorder %s409_s8, %s405_s7 }
   0x8   : > { %p22_p1 = scmp.eq.s32.totalorder %s21_s14, 0  ;;  %p32_p2 = scmp.eq.s32.totalorder %s413_s9, 0 }
   0x9   : > { %p37_p3 = scmp.ne.s32.totalorder %s405_s7, %s401_s6  ;;  %p38_p4 = scmp.eq.s32.totalorder %s452_s10, 0 }
   0xa   : > { %s468_s15 = scalar_select %p22_p1, %s409_s8, %s24_s13  }
   0xb   : > { %p33_p5 = por %p32_p2, %p31_p0  ;;  %p470_p6 = por %p38_p4, %p37_p3 }
   0xc   : > { %p61_p7 = scmp.eq.s32.totalorder %s452_s10, 1  ;;  %p67_p8 = scmp.eq.s32.totalorder %s252_s11, 1 }
   0xd   : > { %p603_p11 = scmp.ge.s32.totalorder %s413_s9, 2 }
   0xe   : > { %p475_p9 = por %p61_p7, %p31_p0  ;;  %p479_p10 = por %p67_p8, %p37_p3 }
   0xf   : > { %83 = sbr.rel (%p603_p11) target bundleno = 57 (0x39), region = 16 }
  0x10   : > { %s606_s18 = scalar_select %p479_p10, 1, 0 }
  0x16   : > { %86 = sbr.rel (!%p33_p5) target bundleno = 57 (0x39), region = 20  ;;  %s87_s19 = sand.u32 (%p33_p5), 1, %s409_s8  }
  0x17   : > { %s256_s20 = sshll.u32 (%p33_p5), %s413_s9, 2  ;;  %s255_s21 = sshll.u32 (%p33_p5), %s87_s19, 5 }
  0x18   : > { %s93_s22 = ssub.s32 (%p33_p5), 7, %s256_s20  ;;  %s491_s25 = scalar_lea.sflag (%p33_p5), [#allocation3], %s87_s19 }
  0x19   : > { %p94_p12 = scmp.lt.s32.totalorder (%p33_p5), %s93_s22, 4  ;;  %s91_s26 = scalar_lea.vmem (%p33_p5), [#allocation2], %s255_s21 }
  0x1d   : > { %s614_s22 = smov (!%p94_p12, %s93_s22), 4 }
  0x1e   : > { %s488_s23 = sshll.u32 %s614_s22, 7 }
  0x1f   : > { %s98_s24 = ssub.s32 512, %s488_s23 }
  0x20   : > { %99 = vsyncadd %s491_s25, %s98_s24  ;;  %p258_p13 = scmp.ne.s32.totalorder %s488_s23, 0  ;;  %s274_s27 = sshll.u32 %s413_s9, 9 }
  0x21   : > { %s499_s30 = scalar_lea.hbm %s601_s0, %s274_s27  ;;  %s104_s2 = sshll.u32 %s91_s26, 4  ;;  %s501_s2 = int_to_ptr.vmem [resolvable:$true] %s104_s2 }
  0x22   : > { %s319_s3 = scalar_lea.hbm %s499_s30, %s488_s23  ;;  %s323_s11 = scalar_lea.hbm %s601_s0, 896 }
  0x23   : > { %p320_p0 = scmp.ne.s32.totalorder %s499_s30, %s319_s3  ;;  %p324_p3 = scmp.lt.u32.totalorder %s499_s30, %s601_s0 }
  0x24   : > { %p325_p4 = scmp.lt.u32.totalorder %s323_s11, %s319_s3  ;;  %p327_p7 = scmp.lt.u32.totalorder %s319_s3, %s499_s30 }
  0x25   : > { %p321_p1 = pnand %p320_p0, %p258_p13 }
  0x26   : > { %p326_p5 = por %p325_p4, %p324_p3 }
  0x27   : > { %p322_p2 = pneg %p321_p1 }
  0x28   : > { %p328_p8 = por %p327_p7, %p326_p5 }
  0x2a   : > { %p329_p12 = pnand %p328_p8, %p322_p2 }
  0x2c   : > { %332 = shalt.err (!%p329_p12)
}
  0x2d   : > { %s333_s19 = scalar_lea.vmem %s501_s2, %s488_s23  ;;  %s415_s20 = smov [#allocation2]  }
  0x2e   : > { %p334_p0 = scmp.ne.s32.totalorder %s501_s2, %s333_s19  ;;  %s337_s21 = sshll.u32 %s415_s20, 4  ;;  %s338_s21 = int_to_ptr.vmem [resolvable:$false] %s337_s21 }
  0x2f   : > { %s339_s22 = scalar_lea.vmem %s338_s21, 1024  ;;  %p340_p10 = scmp.lt.s32.totalorder %s501_s2, %s338_s21 }
  0x30   : > { %p335_p1 = pnand %p334_p0, %p258_p13  ;;  %p341_p3 = scmp.lt.s32.totalorder %s339_s22, %s333_s19 }
  0x32   : > { %p336_p11 = pneg %p335_p1  ;;  %p342_p4 = por %p341_p3, %p340_p10 }
  0x34   : > { %p343_p5 = pnand %p342_p4, %p336_p11 }
  0x36   : > { %346 = shalt.err (!%p343_p5)
}
  0x37   : > { %s416_s24 = smov 128   ;;  %s417_s26 = smov 8  }
  0x38   : > { %110 = dma.hbm_to_vmem [thread:$0]  (%p258_p13), %s499_s30, %s488_s23, %s501_s2, %s491_s25, %s416_s24, %s416_s24, %s417_s26  }
  0x39 PF: > { %p262_p2 = scmp.ge.s32.totalorder %s413_s9, 1  ;;  %p112_p7 = scmp.lt.s32.totalorder %s413_s9, 3 }
  0x3b   : > { %p113_p8 = pnand %p262_p2, %p112_p7 }
  0x3c   : > { %s531_s27 = sand.u32 (!%p113_p8), 1, %s405_s7  }
  0x3d   : > { %116 = sbr.rel (%p113_p8) target bundleno = 105 (0x69), region = 24  ;;  %s263_s28 = sshll.u32 (!%p113_p8), %s531_s27, 5 }
  0x3e   : > { %s119_s29 = scalar_lea.sflag (!%p113_p8), [#allocation3], %s531_s27  ;;  %s122_s3 = scalar_lea.vmem (!%p113_p8), [#allocation2], %s263_s28 }
  0x44   : > { %392 = dma.done.wait (%p470_p6), %s119_s29, 512  }
  0x45   : > { %394 = vsyncadd (%p470_p6), %s119_s29, 4294966784  ;;  %v151_v0 = vld [vmem:[%s122_s3] sm:$0xff]  ;;  %v152_v1 = vld [vmem:[%s122_s3 + $0x8] sm:$0xff]  ;;  %s140_s23 = scalar_lea.vmem [#allocation5], %s263_s28  ;;  %s160_s25 = scalar_lea.sflag [#allocation4], %s531_s27 }
  0x46   : > { %v153_v2 = vld [vmem:[%s122_s3 + $0x10] sm:$0xff]  ;;  %155 = vst [vmem:[%s140_s23] sm:$0xff] %v151_v0  ;;  %156 = vst [vmem:[%s140_s23 + $0x8] sm:$0xff] %v152_v1  ;;  %v154_v3 = vld [vmem:[%s122_s3 + $0x18] sm:$0xff]  ;;  %166 = sbr.rel (!%p475_p9) target bundleno = 105 (0x69), region = 32  ;;  %s266_s30 = sshll.u32 (%p475_p9), %s452_s10, 2 }
  0x47   : > { %157 = vst [vmem:[%s140_s23 + $0x10] sm:$0xff] %v153_v2  ;;  %158 = vst [vmem:[%s140_s23 + $0x18] sm:$0xff] %v154_v3  ;;  %s168_s2 = ssub.s32 (%p475_p9), 7, %s266_s30 }
  0x48   : > { %p169_p10 = scmp.lt.s32.totalorder (%p475_p9), %s168_s2, 4 }
  0x4d   : > { %s616_s2 = smov (!%p169_p10, %s168_s2), 4 }
  0x4e   : > { %s543_s16 = sshll.u32 %s616_s2, 7 }
  0x4f   : > { %s173_s4 = ssub.s32 512, %s543_s16 }
  0x50   : > { %174 = vsyncadd %s160_s25, %s173_s4  ;;  %p268_p6 = scmp.ne.s32.totalorder %s543_s16, 0  ;;  %s275_s5 = sshll.u32 %s452_s10, 9 }
  0x51   : > { %s553_s13 = scalar_lea.hbm %s602_s1, %s275_s5  ;;  %s179_s14 = sshll.u32 %s140_s23, 4  ;;  %s555_s14 = int_to_ptr.vmem [resolvable:$true] %s179_s14 }
  0x52   : > { %s347_s19 = scalar_lea.vmem %s555_s14, %s543_s16  ;;  %s418_s20 = smov [#allocation5]  }
  0x53   : > { %p348_p9 = scmp.ne.s32.totalorder %s555_s14, %s347_s19  ;;  %s351_s21 = sshll.u32 %s418_s20, 4  ;;  %s352_s21 = int_to_ptr.vmem [resolvable:$false] %s351_s21 }
  0x54   : > { %s353_s10 = scalar_lea.vmem %s352_s21, 1024  ;;  %p354_p12 = scmp.lt.s32.totalorder %s555_s14, %s352_s21 }
  0x55   : > { %p349_p11 = pnand %p348_p9, %p268_p6  ;;  %p355_p0 = scmp.lt.s32.totalorder %s353_s10, %s347_s19 }
  0x57   : > { %p350_p13 = pneg %p349_p11  ;;  %p356_p1 = por %p355_p0, %p354_p12 }
  0x59   : > { %p357_p3 = pnand %p356_p1, %p350_p13 }
  0x5b   : > { %360 = shalt.err (!%p357_p3)
}
  0x5c   : > { %s361_s22 = scalar_lea.hbm %s553_s13, %s543_s16  ;;  %s365_s28 = scalar_lea.hbm %s602_s1, 896 }
  0x5d   : > { %p362_p4 = scmp.ne.s32.totalorder %s553_s13, %s361_s22  ;;  %p366_p7 = scmp.lt.u32.totalorder %s553_s13, %s602_s1 }
  0x5e   : > { %p367_p8 = scmp.lt.u32.totalorder %s365_s28, %s361_s22  ;;  %p369_p9 = scmp.lt.u32.totalorder %s361_s22, %s553_s13 }
  0x5f   : > { %p363_p5 = pnand %p362_p4, %p268_p6 }
  0x60   : > { %p368_p10 = por %p367_p8, %p366_p7 }
  0x61   : > { %p364_p2 = pneg %p363_p5 }
  0x62   : > { %p370_p11 = por %p369_p9, %p368_p10 }
  0x64   : > { %p371_p13 = pnand %p370_p11, %p364_p2 }
  0x66   : > { %374 = shalt.err (!%p371_p13)
}
  0x67   : > { %s419_s23 = smov 128   ;;  %s420_s30 = smov 8  }
  0x68   : > { %185 = dma.vmem_to_hbm [thread:$0]  (%p268_p6), %s555_s14, %s543_s16, %s553_s13, %s160_s25, %s419_s23, %s419_s23, %s420_s30  }
  0x69 PF: > { %s194_s2 = sand.u32 1, %s401_s6   ;;  %p607_p12 = scmp.ne.s32.totalorder %s606_s18, 0 }
  0x6a   : > { %p608_p0 = scmp.ge.s32.totalorder %s413_s9, 2  ;;  %s195_s4 = scalar_lea.sflag [#allocation4], %s194_s2 }
  0x6c   : > { %p279_p1 = pnand %p608_p0, %p607_p12 }
  0x6e   : > { %396 = dma.done.wait (!%p279_p1), %s195_s4, 512  }
  0x6f   : > { %398 = vsyncadd (!%p279_p1), %s195_s4, 4294966784  ;;  %p14_p3 = scmp.ge.s32.totalorder %s456_s12, 4   ;;  %s609_s6 = smov %s405_s7 }
  0x70   : > { %s610_s7 = smov %s409_s8  ;;  %s611_s8 = smov %s468_s15 }
  0x71   : > { %s612_s9 = smov %s456_s12  ;;  %16 = sbr.rel (!%p14_p3) target bundleno = 5 (0x5), region = 69 }
  0x78   :  { %200 = vsyncpa [#allocation3], 1 }
  0x79   :  { %202 = vsyncpa [#allocation3 + $0x1], 1 }
  0x7a   :  { %203 = vsyncpa [#allocation4], 1 }
  0x7b   :  { %205 = vsyncpa [#allocation4 + $0x1], 1 }

</bundles_post_ra>
